<compile_context>
chip_gen: v5e
topology: v5e:2x2
jax: 0.10.0
libtpu: 0.0.40
codegen_flags: <defaults>
</compile_context>

<pallas_src>
import jax
import jax.numpy as jnp
from jax.experimental import pallas as pl
from jax.experimental.pallas import tpu as pltpu

ETA = 0.1            # stands in for args.eta (a script-level global in the reference)
M1, M2, G = 0.2, 0.1, 9.8
TR_TARGET = 512      # rows (of 128 lanes each) per block -> 1 MiB f32 per (4, TR, 128) block
SMALL_BATCH = 1024   # below this, plain jnp (fused by XLA) beats the pallas_call fixed cost


def permutation_tensor(n: int) -> jnp.ndarray:
    """torch: M = eye(n); cat([M[n//2:], -M[:n//2]])  (used only by the reference)."""
    M = jnp.eye(n, dtype=jnp.float32)
    return jnp.concatenate([M[n // 2:], -M[: n // 2]], axis=0)


def _hamiltonian_sum(x: jnp.ndarray) -> jnp.ndarray:
    """Batched double-pendulum Hamiltonian, summed over batch. x: (B, 4) f32. (reference)"""
    q1, q2, p1, p2 = x[:, 0], x[:, 1], x[:, 2], x[:, 3]
    c = jnp.cos(q1 - q2)
    s = jnp.sin(q1 - q2)
    num = M2 * p1 ** 2 + (M1 + M2) * p2 ** 2 - 2.0 * M2 * p1 * p2 * c
    den = 2.0 * M2 * (M1 + M2 * s ** 2)
    H = num / den - (M1 + M2) * G * jnp.cos(q1) - M2 * G * jnp.cos(q2)
    return jnp.sum(H)


def _field_components(q1, q2, p1, p2):
    """Closed-form dH + field; transcendentals computed once, elementwise on any shape."""
    c = jnp.cos(q1 - q2)
    s = jnp.sin(q1 - q2)
    sin_q1 = jnp.sin(q1)
    sin_q2 = jnp.sin(q2)

    num = M2 * p1 * p1 + (M1 + M2) * p2 * p2 - 2.0 * M2 * p1 * p2 * c
    den = 2.0 * M2 * (M1 + M2 * s * s)          # always >= 2*M1*M2 > 0
    inv_den = 1.0 / den                          # exact (accuracy budget is 1e-5)

    # d(num/den)/dq1 = num'/den - num*den'/den^2 ; the dq2 term is its negation.
    g1 = (2.0 * M2 * p1 * p2 * s) * inv_den \
        - num * (4.0 * M2 * M2 * s * c) * (inv_den * inv_den)

    dH_q1 = g1 + (M1 + M2) * G * sin_q1
    dH_q2 = -g1 + M2 * G * sin_q2
    dH_p1 = (2.0 * M2 * p1 - 2.0 * M2 * p2 * c) * inv_den
    dH_p2 = (2.0 * (M1 + M2) * p2 - 2.0 * M2 * p1 * c) * inv_den

    # field = dH @ M.T (signed permutation, hardcoded), formed before damping;
    # damping -eta*dH only touches the p-columns (q-columns of dH are zeroed first).
    return (dH_p1,
            dH_p2,
            -dH_q1 - ETA * dH_p1,
            -dH_q2 - ETA * dH_p2)


def _ode_d_pendulum_kernel(x_ref, out_ref):
    """x_ref/out_ref: (4, TR, 128) f32 blocks; component planes are full (TR,128) slabs."""
    q1 = x_ref[0]
    q2 = x_ref[1]
    p1 = x_ref[2]
    p2 = x_ref[3]

    f0, f1, f2, f3 = _field_components(q1, q2, p1, p2)

    # Direct per-component stores: no cross-sublane concatenate, unmasked vst.
    out_ref[0] = f0
    out_ref[1] = f1
    out_ref[2] = f2
    out_ref[3] = f3


def _closed_form_jnp(x: jnp.ndarray) -> jnp.ndarray:
    """Small-batch fallback: same closed form, plain jnp (XLA fuses it)."""
    xf = x.astype(jnp.float32)
    f0, f1, f2, f3 = _field_components(xf[:, 0], xf[:, 1], xf[:, 2], xf[:, 3])
    return jnp.stack([f0, f1, f2, f3], axis=1)


def ode_d_pendulum_forward(t, x, *, tr_target: int = TR_TARGET, force_pallas: bool = False):
    """Equivalent of ODE_d_pendulum.forward(t, x). t is unused (as in torch)."""
    del t
    B, D = x.shape
    assert D == 4, "double pendulum state is (q1, q2, p1, p2)"

    if B < SMALL_BATCH and not force_pallas:
        # Pallas fixed cost + relayout dominates at tiny batch; use fused XLA path.
        return _closed_form_jnp(x).astype(x.dtype)

    # Lane/sublane-dense layout: (B, 4) -> (4, B), pad batch only to a multiple of
    # 128 lanes, then a free contiguous reshape to (4, rows, 128).
    # TODO(synk): if the caller (e.g. an ODE integrator loop) keeps state in this
    # layout, the transpose/pad/slice round trips can be hoisted out of the time loop.
    Bp = pl.cdiv(B, 128) * 128
    xt = x.T.astype(jnp.float32)
    if Bp != B:
        xt = jnp.pad(xt, ((0, 0), (0, Bp - B)))   # zero-pad -> den > 0, no Inf/NaN
    rows = Bp // 128
    x3 = xt.reshape(4, rows, 128)

    # Block row-count: either the full row extent or a multiple of 8 (TR_TARGET).
    tr = rows if rows < tr_target else tr_target
    grid = pl.cdiv(rows, tr)

    out3 = pl.pallas_call(
        _ode_d_pendulum_kernel,
        out_shape=jax.ShapeDtypeStruct((4, rows, 128), jnp.float32),
        grid_spec=pltpu.PrefetchScalarGridSpec(
            num_scalar_prefetch=0,
            grid=(grid,),
            in_specs=[pl.BlockSpec((4, tr, 128), lambda i: (0, i, 0))],
            out_specs=pl.BlockSpec((4, tr, 128), lambda i: (0, i, 0)),
        ),
        compiler_params=pltpu.CompilerParams(
            dimension_semantics=("parallel",),   # lets v7x shard grid steps over 2 TCs
        ),
    )(x3)

    out = out3.reshape(4, Bp)[:, :B].T
    return out.astype(x.dtype)


def _reference_forward(x):
    """Pure-JAX reference mirroring the torch module (autograd + explicit M.T matmul)."""
    xf = x.astype(jnp.float32)
    dH = jax.grad(_hamiltonian_sum)(xf)
    Mt = permutation_tensor(4).T
    field = dH @ Mt
    dH = dH.at[:, 0].set(0.0).at[:, 1].set(0.0)
    return field - ETA * dH


if __name__ == "__main__":
    key = jax.random.PRNGKey(0)
    B = 16
    x = jax.random.normal(key, (B, 4), dtype=jnp.float32)
    t = jnp.zeros((), dtype=jnp.float32)

    ref = _reference_forward(x)

    # Exercise the Pallas kernel path (padding B=16 -> 128 lanes, 1 row-block).
    out = ode_d_pendulum_forward(t, x, force_pallas=True)
    out = jax.block_until_ready(out)
    assert out.shape == (B, 4) and out.dtype == jnp.float32
    assert jnp.allclose(out, ref, rtol=1e-5, atol=1e-5)

    # Also check the small-batch jnp fallback path agrees.
    out_fb = jax.block_until_ready(ode_d_pendulum_forward(t, x))
    assert jnp.allclose(out_fb, ref, rtol=1e-5, atol=1e-5)

    print("KERNEL_OK")
</pallas_src>

<mosaic_0001>
module attributes {stable_mosaic.version = 11 : i64} {
  func.func @_ode_d_pendulum_kernel(%arg0: i32, %arg1: memref<4x1x128xf32, #tpu.memory_space<vmem>>, %arg2: memref<4x1x128xf32, #tpu.memory_space<vmem>>) attributes {dimension_semantics = [#tpu.dimension_semantics<parallel>], iteration_bounds = array<i64: 1>, scalar_prefetch = 0 : i64, scratch_operands = 0 : i64, tpu.core_type = #tpu.core_type<tc>, window_params = [{transform_indices = @transform_0, window_bounds = array<i64: 4, 1, 128>}, {transform_indices = @transform_1, window_bounds = array<i64: 4, 1, 128>}]} {
    %c0 = arith.constant 0 : index
    %c0_0 = arith.constant 0 : index
    %c0_1 = arith.constant 0 : index
    %0 = vector.load %arg1[%c0, %c0_0, %c0_1] : memref<4x1x128xf32, #tpu.memory_space<vmem>>, vector<1x1x128xf32>
    %1 = vector.shape_cast %0 : vector<1x1x128xf32> to vector<1x128xf32>
    %c1 = arith.constant 1 : index
    %c0_2 = arith.constant 0 : index
    %c0_3 = arith.constant 0 : index
    %2 = vector.load %arg1[%c1, %c0_2, %c0_3] : memref<4x1x128xf32, #tpu.memory_space<vmem>>, vector<1x1x128xf32>
    %3 = vector.shape_cast %2 : vector<1x1x128xf32> to vector<1x128xf32>
    %c2 = arith.constant 2 : index
    %c0_4 = arith.constant 0 : index
    %c0_5 = arith.constant 0 : index
    %4 = vector.load %arg1[%c2, %c0_4, %c0_5] : memref<4x1x128xf32, #tpu.memory_space<vmem>>, vector<1x1x128xf32>
    %5 = vector.shape_cast %4 : vector<1x1x128xf32> to vector<1x128xf32>
    %c3 = arith.constant 3 : index
    %c0_6 = arith.constant 0 : index
    %c0_7 = arith.constant 0 : index
    %6 = vector.load %arg1[%c3, %c0_6, %c0_7] : memref<4x1x128xf32, #tpu.memory_space<vmem>>, vector<1x1x128xf32>
    %7 = vector.shape_cast %6 : vector<1x1x128xf32> to vector<1x128xf32>
    %8 = arith.subf %1, %3 : vector<1x128xf32>
    %9 = math.cos %8 : vector<1x128xf32>
    %10 = arith.subf %1, %3 : vector<1x128xf32>
    %11 = math.sin %10 : vector<1x128xf32>
    %12 = math.sin %1 : vector<1x128xf32>
    %13 = math.sin %3 : vector<1x128xf32>
    %cst = arith.constant 1.000000e-01 : f32
    %14 = vector.broadcast %cst : f32 to vector<1x128xf32>
    %15 = arith.mulf %14, %5 : vector<1x128xf32>
    %16 = arith.mulf %15, %5 : vector<1x128xf32>
    %cst_8 = arith.constant 3.000000e-01 : f32
    %17 = vector.broadcast %cst_8 : f32 to vector<1x128xf32>
    %18 = arith.mulf %17, %7 : vector<1x128xf32>
    %19 = arith.mulf %18, %7 : vector<1x128xf32>
    %20 = arith.addf %16, %19 : vector<1x128xf32>
    %cst_9 = arith.constant 2.000000e-01 : f32
    %21 = vector.broadcast %cst_9 : f32 to vector<1x128xf32>
    %22 = arith.mulf %21, %5 : vector<1x128xf32>
    %23 = arith.mulf %22, %7 : vector<1x128xf32>
    %24 = arith.mulf %23, %9 : vector<1x128xf32>
    %25 = arith.subf %20, %24 : vector<1x128xf32>
    %cst_10 = arith.constant 1.000000e-01 : f32
    %26 = vector.broadcast %cst_10 : f32 to vector<1x128xf32>
    %27 = arith.mulf %26, %11 : vector<1x128xf32>
    %28 = arith.mulf %27, %11 : vector<1x128xf32>
    %cst_11 = arith.constant 2.000000e-01 : f32
    %29 = vector.broadcast %cst_11 : f32 to vector<1x128xf32>
    %30 = arith.addf %29, %28 : vector<1x128xf32>
    %cst_12 = arith.constant 2.000000e-01 : f32
    %31 = vector.broadcast %cst_12 : f32 to vector<1x128xf32>
    %32 = arith.mulf %31, %30 : vector<1x128xf32>
    %cst_13 = arith.constant 1.000000e+00 : f32
    %33 = vector.broadcast %cst_13 : f32 to vector<1x128xf32>
    %34 = arith.divf %33, %32 : vector<1x128xf32>
    %cst_14 = arith.constant 2.000000e-01 : f32
    %35 = vector.broadcast %cst_14 : f32 to vector<1x128xf32>
    %36 = arith.mulf %35, %5 : vector<1x128xf32>
    %37 = arith.mulf %36, %7 : vector<1x128xf32>
    %38 = arith.mulf %37, %11 : vector<1x128xf32>
    %39 = arith.mulf %38, %34 : vector<1x128xf32>
    %cst_15 = arith.constant 4.000000e-02 : f32
    %40 = vector.broadcast %cst_15 : f32 to vector<1x128xf32>
    %41 = arith.mulf %40, %11 : vector<1x128xf32>
    %42 = arith.mulf %41, %9 : vector<1x128xf32>
    %43 = arith.mulf %25, %42 : vector<1x128xf32>
    %44 = arith.mulf %34, %34 : vector<1x128xf32>
    %45 = arith.mulf %43, %44 : vector<1x128xf32>
    %46 = arith.subf %39, %45 : vector<1x128xf32>
    %cst_16 = arith.constant 2.940000e+00 : f32
    %47 = vector.broadcast %cst_16 : f32 to vector<1x128xf32>
    %48 = arith.mulf %47, %12 : vector<1x128xf32>
    %49 = arith.addf %46, %48 : vector<1x128xf32>
    %cst_17 = arith.constant 0.000000e+00 : f32
    %50 = vector.broadcast %cst_17 : f32 to vector<1x128xf32>
    %51 = arith.subf %50, %46 : vector<1x128xf32>
    %cst_18 = arith.constant 9.800000e-01 : f32
    %52 = vector.broadcast %cst_18 : f32 to vector<1x128xf32>
    %53 = arith.mulf %52, %13 : vector<1x128xf32>
    %54 = arith.addf %51, %53 : vector<1x128xf32>
    %cst_19 = arith.constant 2.000000e-01 : f32
    %55 = vector.broadcast %cst_19 : f32 to vector<1x128xf32>
    %56 = arith.mulf %55, %5 : vector<1x128xf32>
    %cst_20 = arith.constant 2.000000e-01 : f32
    %57 = vector.broadcast %cst_20 : f32 to vector<1x128xf32>
    %58 = arith.mulf %57, %7 : vector<1x128xf32>
    %59 = arith.mulf %58, %9 : vector<1x128xf32>
    %60 = arith.subf %56, %59 : vector<1x128xf32>
    %61 = arith.mulf %60, %34 : vector<1x128xf32>
    %cst_21 = arith.constant 6.000000e-01 : f32
    %62 = vector.broadcast %cst_21 : f32 to vector<1x128xf32>
    %63 = arith.mulf %62, %7 : vector<1x128xf32>
    %cst_22 = arith.constant 2.000000e-01 : f32
    %64 = vector.broadcast %cst_22 : f32 to vector<1x128xf32>
    %65 = arith.mulf %64, %5 : vector<1x128xf32>
    %66 = arith.mulf %65, %9 : vector<1x128xf32>
    %67 = arith.subf %63, %66 : vector<1x128xf32>
    %68 = arith.mulf %67, %34 : vector<1x128xf32>
    %cst_23 = arith.constant 0.000000e+00 : f32
    %69 = vector.broadcast %cst_23 : f32 to vector<1x128xf32>
    %70 = arith.subf %69, %49 : vector<1x128xf32>
    %cst_24 = arith.constant 1.000000e-01 : f32
    %71 = vector.broadcast %cst_24 : f32 to vector<1x128xf32>
    %72 = arith.mulf %71, %61 : vector<1x128xf32>
    %73 = arith.subf %70, %72 : vector<1x128xf32>
    %cst_25 = arith.constant 0.000000e+00 : f32
    %74 = vector.broadcast %cst_25 : f32 to vector<1x128xf32>
    %75 = arith.subf %74, %54 : vector<1x128xf32>
    %cst_26 = arith.constant 1.000000e-01 : f32
    %76 = vector.broadcast %cst_26 : f32 to vector<1x128xf32>
    %77 = arith.mulf %76, %68 : vector<1x128xf32>
    %78 = arith.subf %75, %77 : vector<1x128xf32>
    %c0_27 = arith.constant 0 : index
    %c0_28 = arith.constant 0 : index
    %c0_29 = arith.constant 0 : index
    %79 = vector.load %arg2[%c0_27, %c0_28, %c0_29] : memref<4x1x128xf32, #tpu.memory_space<vmem>>, vector<1x1x128xf32>
    %80 = vector.shape_cast %79 : vector<1x1x128xf32> to vector<1x128xf32>
    %81 = vector.shape_cast %61 : vector<1x128xf32> to vector<1x1x128xf32>
    tpu.vector_store %arg2[%c0_27, %c0_28, %c0_29], %81 {strides = array<i32>} : memref<4x1x128xf32, #tpu.memory_space<vmem>>, vector<1x1x128xf32>,
    %c1_30 = arith.constant 1 : index
    %c0_31 = arith.constant 0 : index
    %c0_32 = arith.constant 0 : index
    %82 = vector.load %arg2[%c1_30, %c0_31, %c0_32] : memref<4x1x128xf32, #tpu.memory_space<vmem>>, vector<1x1x128xf32>
    %83 = vector.shape_cast %82 : vector<1x1x128xf32> to vector<1x128xf32>
    %84 = vector.shape_cast %68 : vector<1x128xf32> to vector<1x1x128xf32>
    tpu.vector_store %arg2[%c1_30, %c0_31, %c0_32], %84 {strides = array<i32>} : memref<4x1x128xf32, #tpu.memory_space<vmem>>, vector<1x1x128xf32>,
    %c2_33 = arith.constant 2 : index
    %c0_34 = arith.constant 0 : index
    %c0_35 = arith.constant 0 : index
    %85 = vector.load %arg2[%c2_33, %c0_34, %c0_35] : memref<4x1x128xf32, #tpu.memory_space<vmem>>, vector<1x1x128xf32>
    %86 = vector.shape_cast %85 : vector<1x1x128xf32> to vector<1x128xf32>
    %87 = vector.shape_cast %73 : vector<1x128xf32> to vector<1x1x128xf32>
    tpu.vector_store %arg2[%c2_33, %c0_34, %c0_35], %87 {strides = array<i32>} : memref<4x1x128xf32, #tpu.memory_space<vmem>>, vector<1x1x128xf32>,
    %c3_36 = arith.constant 3 : index
    %c0_37 = arith.constant 0 : index
    %c0_38 = arith.constant 0 : index
    %88 = vector.load %arg2[%c3_36, %c0_37, %c0_38] : memref<4x1x128xf32, #tpu.memory_space<vmem>>, vector<1x1x128xf32>
    %89 = vector.shape_cast %88 : vector<1x1x128xf32> to vector<1x128xf32>
    %90 = vector.shape_cast %78 : vector<1x128xf32> to vector<1x1x128xf32>
    tpu.vector_store %arg2[%c3_36, %c0_37, %c0_38], %90 {strides = array<i32>} : memref<4x1x128xf32, #tpu.memory_space<vmem>>, vector<1x1x128xf32>,
    return
  }
  func.func @transform_0(%arg0: i32) -> (i32, i32, i32) {
    %c0_i32 = arith.constant 0 : i32
    %c0_i32_0 = arith.constant 0 : i32
    %c0_i32_1 = arith.constant 0 : i32
    return %c0_i32, %arg0, %c0_i32_0 : i32, i32, i32
  }
  func.func @transform_1(%arg0: i32) -> (i32, i32, i32) {
    %c0_i32 = arith.constant 0 : i32
    %c0_i32_0 = arith.constant 0 : i32
    %c0_i32_1 = arith.constant 0 : i32
    return %c0_i32, %arg0, %c0_i32_0 : i32, i32, i32
  }
}

</mosaic_0001>

<bundles_post_ra>
// kernel: tpu_custom_call.1
= control target key start
LH: loop header
LB: loop body
LE: loop exit
PB: predicated region body
PF: predicated region fallthrough
CT: control target
= control target key end

     0   :  { %6 = vsyncpa [#allocation3], 0  ;;  %s1179_s0 = inlined_call_operand.hbm [shape: f32[4,1,128], index: 0, kind: input, shape index: {}]   ;;  %s1180_s1 = inlined_call_operand.hbm [shape: f32[4,1,128], index: 1, kind: output, shape index: {}]  }
   0x1   :  { %7 = vsyncpa [#allocation4], 0  ;;  %s12_s8 = sshll.u32 %s1179_s0, 4  ;;  %s810_s9 = smov [#allocation2]   ;;  %s13_s8 = int_to_ptr.hbm [resolvable:$true] %s12_s8 }
   0x2   :  { %s14_s10 = sshll.u32 %s810_s9, 4  ;;  %s811_s11 = smov 16   ;;  %s15_s10 = int_to_ptr.vmem [resolvable:$true] %s14_s10 }
   0x3   :  { %s812_s12 = smov 1  }
   0x4   :  { %20 = dma.hbm_to_vmem [thread:$0]  %s13_s8, 64, %s15_s10, [#allocation3], %s811_s11, %s811_s11, %s812_s12  }
   0x5   :  { %806 = dma.done.wait [#allocation3], 64  }
   0x6   :  { %807 = vsyncadd [#allocation3], 4294967232  ;;  %v837_v0 = vld [vmem:[#allocation2] sm:$0x1]  ;;  %v839_v1 = vld [vmem:[#allocation2 + $0x1] sm:$0x1] }
   0x7   :  { %v843_v2 = vsub.f32 %v837_v0, %v839_v1  ;;  %v345_v5 = vand.u32 2139095040, %v837_v0  ;;  %v500_v20 = vand.u32 2139095040, %v839_v1  ;;  %v813_v22 = vmov 683565275   ;;  %s820_s0 = smov [#allocation5]   ;;  %s720_s16 = sshll.u32 %s1180_s1, 4  ;;  %s721_s16 = int_to_ptr.hbm [resolvable:$true] %s720_s16 }
   0x8   :  { %v814_v24 = vmov 2475754826   ;;  %v815_v26 = vmov 2131351028   ;;  %v816_v28 = vmov 2102212464  }
   0x9   :  { %v33_v3 = vand.u32 2147483647, %v843_v2  ;;  %v36_v4 = vand.u32 2139095040, %v843_v2  ;;  %v346_v8 = vshrl.u32 %v345_v5, 23  ;;  %v817_v30 = vmov 920167782  }
   0xa   :  { %v818_v38 = vmov 1326507024   ;;  %v342_v43 = vand.u32 2147483647, %v837_v0  ;;  %s718_s13 = sshll.u32 %s820_s0, 4  ;;  %s719_s13 = int_to_ptr.vmem [resolvable:$true] %s718_s13 }
   0xb   :  { %v37_v6 = vshrl.u32 %v36_v4, 23  ;;  %v40_v7 = vand.u32 8388607, %v33_v3  ;;  %v739_v11 = vadd.s32 4294967169, %v346_v8 }
   0xc   :  { %v876_v54 = vand.u32 8388607, %v342_v43 }
   0xd   :  { %v733_v9 = vadd.s32 4294967169, %v37_v6  ;;  %v41_v10 = vor.u32 8388608, %v40_v7  ;;  %v352_v14 = vadd.s32 1, %v739_v11 }
   0xe   :  { %v350_v7 = vor.u32 8388608, %v876_v54 }
   0xf   :  { %v43_v12 = vadd.s32 1, %v733_v9  ;;  %v850_v13 = vshll.u32 %v41_v10, 8  ;;  %vm353_vm1 = vcmp.gt.s32.totalorder %v352_v14, 0 }
  0x10   :  { %v354_v18 = vsel %vm353_vm1, %v352_v14, 0 }
  0x11   :  { %vm44_vm0 = vcmp.gt.s32.totalorder %v43_v12, 0  ;;  %v82_v19 = vand.u32 65535, %v850_v13  ;;  %v859_v32 = vand.u32 31, %v354_v18  ;;  %v83_v57 = vshrl.u32 %v850_v13, 16 }
  0x12   :  { %v45_v15 = vsel %vm44_vm0, %v43_v12, 0  ;;  %v879_v58 = vshrl.u32 %v354_v18, 5 }
  0x13   :  { %v46_v16 = vshrl.u32 %v45_v15, 5  ;;  %v47_v17 = vand.u32 31, %v45_v15  ;;  %v869_v46 = vsub.s32 32, %v859_v32  ;;  %v359_v62 = vshll.u32 %v813_v22, %v859_v32 }
  0x14   :  { %v362_v9 = vshll.u32 %v814_v24, %v859_v32  ;;  %v365_v15 = vshll.u32 %v815_v26, %v859_v32  ;;  %vm374_vm10 = vcmp.lt.s32.totalorder %v879_v58, 1  ;;  %vm376_vm11 = vcmp.lt.s32.totalorder %v879_v58, 3 }
  0x15   :  { %v48_v21 = vsub.s32 32, %v47_v17  ;;  %v50_v23 = vshll.u32 %v813_v22, %v47_v17  ;;  %v53_v25 = vshll.u32 %v814_v24, %v47_v17  ;;  %v56_v27 = vshll.u32 %v815_v26, %v47_v17 }
  0x16   :  { %v59_v29 = vshll.u32 %v816_v28, %v47_v17  ;;  %v62_v31 = vshll.u32 %v817_v30, %v47_v17  ;;  %vm65_vm2 = vcmp.lt.s32.totalorder %v46_v16, 1  ;;  %vm66_vm3 = vcmp.lt.s32.totalorder %v46_v16, 2 }
  0x17   :  { %v49_v33 = vshrl.u32 %v813_v22, %v48_v21  ;;  %v51_v34 = vshrl.u32 %v814_v24, %v48_v21  ;;  %v54_v35 = vshrl.u32 %v815_v26, %v48_v21  ;;  %v57_v36 = vshrl.u32 %v816_v28, %v48_v21 }
  0x18   :  { %v60_v37 = vshrl.u32 %v817_v30, %v48_v21  ;;  %v63_v39 = vshrl.u32 %v818_v38, %v48_v21  ;;  %vm68_vm4 = vcmp.lt.s32.totalorder %v46_v16, 4  ;;  %vm67_vm5 = vcmp.lt.s32.totalorder %v46_v16, 3 }
  0x19   :  { %v52_v40 = vor.u32 %v51_v34, %v50_v23  ;;  %v55_v41 = vor.u32 %v54_v35, %v53_v25  ;;  %v58_v42 = vor.u32 %v57_v36, %v56_v27  ;;  %v360_v8 = vshrl.u32 %v814_v24, %v869_v46 }
  0x1a   :  { %v61_v44 = vor.u32 %v60_v37, %v59_v29  ;;  %v64_v45 = vor.u32 %v63_v39, %v62_v31  ;;  %v363_v10 = vshrl.u32 %v815_v26, %v869_v46  ;;  %vm375_vm12 = vcmp.lt.s32.totalorder %v879_v58, 2 }
  0x1b   :  { %v69_v47 = vsel %vm65_vm2, %v49_v33, %v52_v40  ;;  %v70_v48 = vsel %vm68_vm4, %v58_v42, 2102212464  ;;  %v73_v49 = vsel %vm65_vm2, %v52_v40, %v55_v41  ;;  %v77_v50 = vsel %vm65_vm2, %v55_v41, %v58_v42 }
  0x1c   :  { %v71_v51 = vsel %vm67_vm5, %v55_v41, %v70_v48  ;;  %v74_v52 = vsel %vm68_vm4, %v61_v44, 920167782  ;;  %v78_v53 = vsel %vm68_vm4, %v64_v45, 1326507024  ;;  %v897_v39 = vor.u32 %v360_v8, %v359_v62 }
  0x1d   :  { %v75_v55 = vsel %vm67_vm5, %v58_v42, %v74_v52  ;;  %v79_v56 = vsel %vm67_vm5, %v61_v44, %v78_v53  ;;  %v882_v59 = vsel %vm66_vm3, %v69_v47, %v71_v51  ;;  %v819_v40 = vmov 0  }
  0x1e   :  { %v76_v60 = vsel %vm66_vm3, %v73_v49, %v75_v55  ;;  %v80_v61 = vsel %vm66_vm3, %v77_v50, %v79_v56  ;;  %v368_v47 = vshll.u32 %v816_v28, %v859_v32  ;;  %v906_v50 = vor.u32 %v363_v10, %v362_v9 }
  0x1f   :  { %v84_v63 = vand.u32 65535, %v80_v61  ;;  %v85_v4 = vshrl.u32 %v80_v61, 16  ;;  %v106_v5 = vand.u32 65535, %v76_v60  ;;  %v107_v6 = vshrl.u32 %v76_v60, 16 }
  0x20   :  { %v369_v55 = vshrl.u32 %v817_v30, %v869_v46  ;;  %v372_v60 = vshrl.u32 %v818_v38, %v869_v46  ;;  %vm377_vm13 = vcmp.lt.s32.totalorder %v879_v58, 4 }
  0x21   :  { %v86_v11 = vmul.u32 %v84_v63, %v82_v19  ;;  %v87_v12 = vmul.u32 %v85_v4, %v82_v19  ;;  %v88_v14 = vmul.u32 %v84_v63, %v83_v57  ;;  %v89_v16 = vmul.u32 %v85_v4, %v83_v57 }
  0x22   :  { %v108_v17 = vmul.u32 %v106_v5, %v82_v19  ;;  %v109_v18 = vmul.u32 %v107_v6, %v82_v19  ;;  %v110_v21 = vmul.u32 %v106_v5, %v83_v57  ;;  %v111_v29 = vmul.u32 %v107_v6, %v83_v57 }
  0x23   :  { %v90_v23 = vshll.u32 %v87_v12, 16  ;;  %v91_v25 = vshrl.u32 %v87_v12, 16  ;;  %v92_v27 = vshll.u32 %v88_v14, 16  ;;  %v93_v31 = vshrl.u32 %v88_v14, 16 }
  0x24   :  { %v112_v33 = vshll.u32 %v109_v18, 16  ;;  %v113_v34 = vshrl.u32 %v109_v18, 16  ;;  %v114_v35 = vshll.u32 %v110_v21, 16  ;;  %v115_v37 = vshrl.u32 %v110_v21, 16 }
  0x25   :  { %vm94_vm6 = vc.u32 %v86_v11, %v90_v23  ;;  %v96_v36 = vadd.s32 %v90_v23, %v86_v11  ;;  %v366_v19 = vshrl.u32 %v816_v28, %v869_v46  ;;  %v371_v57 = vshll.u32 %v817_v30, %v859_v32 }
  0x26   :  { %v95_v41 = vsel %vm94_vm6, 1, %v819_v40  ;;  %vm116_vm7 = vc.u32 %v108_v17, %v112_v33  ;;  %v118_v42 = vadd.s32 %v112_v33, %v108_v17  ;;  %v370_v63 = vor.u32 %v369_v55, %v368_v47 }
  0x27   :  { %v97_v44 = vadd.s32 %v95_v41, %v89_v16  ;;  %vm98_vm8 = vc.u32 %v96_v36, %v92_v27  ;;  %v117_v45 = vsel %vm116_vm7, 1, %v819_v40  ;;  %v909_v53 = vor.u32 %v366_v19, %v365_v15 }
  0x28   :  { %v99_v48 = vsel %vm98_vm8, 1, %v819_v40  ;;  %v119_v49 = vadd.s32 %v117_v45, %v111_v29  ;;  %vm120_vm9 = vc.u32 %v118_v42, %v114_v35  ;;  %v918_v62 = vadd.s32 %v118_v42, %v114_v35 }
  0x29   :  { %v101_v51 = vadd.s32 %v99_v48, %v97_v44  ;;  %v121_v52 = vsel %vm120_vm9, 1, %v819_v40  ;;  %v373_v5 = vor.u32 %v372_v60, %v371_v57  ;;  %v382_v32 = vsel %vm374_vm10, %v897_v39, %v906_v50 }
  0x2a   :  { %v123_v56 = vadd.s32 %v121_v52, %v119_v49  ;;  %v383_v8 = vsel %vm377_vm13, %v370_v63, 920167782  ;;  %v126_v11 = vmul.u32 %v850_v13, %v882_v59  ;;  %v501_v14 = vshrl.u32 %v500_v20, 23 }
  0x2b   :  { %v102_v61 = vadd.s32 %v101_v51, %v91_v25  ;;  %v384_v10 = vsel %vm376_vm11, %v909_v53, %v383_v8  ;;  %v386_v16 = vsel %vm374_vm10, %v906_v50, %v909_v53  ;;  %v387_v17 = vsel %vm377_vm13, %v373_v5, 1326507024 }
  0x2c   :  { %v124_v4 = vadd.s32 %v123_v56, %v113_v34  ;;  %v385_v12 = vsel %vm375_vm12, %v382_v32, %v384_v10  ;;  %v950_v13 = vshll.u32 %v350_v7, 8  ;;  %v388_v59 = vsel %vm376_vm11, %v370_v63, %v387_v17 }
  0x2d   :  { %v923_v6 = vadd.s32 %v102_v61, %v93_v31  ;;  %v415_v18 = vand.u32 65535, %v385_v12  ;;  %v416_v21 = vshrl.u32 %v385_v12, 16  ;;  %v389_v20 = vsel %vm375_vm12, %v386_v16, %v388_v59 }
  0x2e   :  { %v125_v9 = vadd.s32 %v124_v4, %v115_v37  ;;  %v391_v25 = vand.u32 65535, %v950_v13  ;;  %v392_v27 = vshrl.u32 %v950_v13, 16  ;;  %v393_v31 = vand.u32 65535, %v389_v20 }
  0x2f   :  { %vm128_vm14 = vc.u32 %v923_v6, %v918_v62  ;;  %v394_v33 = vshrl.u32 %v389_v20, 16  ;;  %v742_v35 = vadd.s32 4294967169, %v501_v14  ;;  %v358_v60 = vshrl.u32 %v813_v22, %v869_v46 }
  0x30   :  { %v129_v15 = vadd.s32 1, %v125_v9  ;;  %v417_v34 = vmul.u32 %v415_v18, %v391_v25  ;;  %v418_v54 = vmul.u32 %v416_v21, %v391_v25  ;;  %v419_v7 = vmul.u32 %v415_v18, %v392_v27 }
  0x31   :  { %v395_v37 = vmul.u32 %v393_v31, %v391_v25  ;;  %v396_v41 = vmul.u32 %v394_v33, %v391_v25  ;;  %v397_v42 = vmul.u32 %v393_v31, %v392_v27  ;;  %v398_v47 = vmul.u32 %v394_v33, %v392_v27 }
  0x32   :  { %v130_v23 = vsel %vm128_vm14, %v129_v15, %v125_v9  ;;  %v421_v19 = vshll.u32 %v418_v54, 16  ;;  %v423_v44 = vshll.u32 %v419_v7, 16  ;;  %v420_v51 = vmul.u32 %v416_v21, %v392_v27 }
  0x33   :  { %v131_v29 = vadd.s32 %v130_v23, %v126_v11  ;;  %v399_v48 = vshll.u32 %v396_v41, 16  ;;  %v401_v49 = vshll.u32 %v397_v42, 16  ;;  %v507_v57 = vadd.s32 1, %v742_v35 }
  0x34   :  { %vm425_vm15 = vc.u32 %v417_v34, %v421_v19  ;;  %v427_v52 = vadd.s32 %v421_v19, %v417_v34  ;;  %v400_v5 = vshrl.u32 %v396_v41, 16  ;;  %v422_v9 = vshrl.u32 %v418_v54, 16 }
  0x35   :  { %v132_v36 = vadd.s32 536870912, %v131_v29  ;;  %vm403_vm0 = vc.u32 %v395_v37, %v399_v48  ;;  %v405_v56 = vadd.s32 %v399_v48, %v395_v37  ;;  %v426_v63 = vsel %vm425_vm15, 1, %v819_v40 }
  0x36   :  { %v404_v61 = vsel %vm403_vm0, 1, %v819_v40  ;;  %vm429_vm1 = vc.u32 %v427_v52, %v423_v44  ;;  %v428_v10 = vadd.s32 %v426_v63, %v420_v51  ;;  %v379_v46 = vsel %vm377_vm13, %v909_v53, 2102212464 }
  0x37   :  { %v958_v45 = vshrl.u32 %v132_v36, 30  ;;  %v406_v32 = vadd.s32 %v404_v61, %v398_v47  ;;  %vm407_vm2 = vc.u32 %v405_v56, %v401_v49  ;;  %v430_v11 = vsel %vm429_vm1, 1, %v819_v40 }
  0x38   :  { %v408_v8 = vsel %vm407_vm2, 1, %v819_v40  ;;  %v402_v15 = vshrl.u32 %v397_v42, 16  ;;  %v424_v16 = vshrl.u32 %v419_v7, 16  ;;  %v432_v17 = vadd.s32 %v430_v11, %v428_v10 }
  0x39   :  { %v134_v55 = vshll.u32 %v958_v45, 30  ;;  %v410_v14 = vadd.s32 %v408_v8, %v406_v32  ;;  %vm508_vm4 = vcmp.gt.s32.totalorder %v507_v57, 0  ;;  %v497_v25 = vand.u32 2147483647, %v839_v1 }
  0x3a   :  { %v509_v21 = vsel %vm508_vm4, %v507_v57, 0  ;;  %v433_v20 = vadd.s32 %v432_v17, %v422_v9  ;;  %v378_v27 = vsel %vm374_vm10, %v358_v60, %v897_v39  ;;  %v380_v53 = vsel %vm376_vm11, %v906_v50, %v379_v46 }
  0x3b   :  { %v135_v4 = vsub.s32 %v131_v29, %v134_v55  ;;  %v411_v18 = vadd.s32 %v410_v14, %v400_v5  ;;  %v511_v29 = vand.u32 31, %v509_v21  ;;  %v979_v34 = vadd.s32 %v427_v52, %v423_v44 }
  0x3c   :  { %v434_v54 = vadd.s32 %v433_v20, %v424_v16  ;;  %v127_v7 = vadd.s32 %v918_v62, %v923_v6  ;;  %v381_v35 = vsel %vm375_vm12, %v378_v27, %v380_v53  ;;  %v504_v39 = vand.u32 8388607, %v497_v25 }
  0x3d   :  { %vm136_vm3 = vcmp.lt.s32.totalorder %v135_v4, 0  ;;  %v137_v12 = vsub.s32 0, %v135_v4  ;;  %v977_v33 = vadd.s32 %v411_v18, %v402_v15  ;;  %v987_v50 = vsub.s32 32, %v511_v29 }
  0x3e   :  { %v438_v37 = vadd.s32 1, %v434_v54  ;;  %v435_v44 = vmul.u32 %v950_v13, %v381_v35  ;;  %v157_v58 = vsub.s32 4, %v958_v45  ;;  %v505_v47 = vor.u32 8388608, %v504_v39 }
  0x3f   :  { %v138_v59 = vsel %vm136_vm3, %v137_v12, %v135_v4  ;;  %vm437_vm6 = vc.u32 %v977_v33, %v979_v34  ;;  %v993_v49 = vshrl.u32 %v509_v21, 5  ;;  %v517_v51 = vshll.u32 %v814_v24, %v511_v29 }
  0x40   :  { %v139_v23 = vclz %v138_v59  ;;  %v439_v48 = vsel %vm437_vm6, %v438_v37, %v434_v54  ;;  %v518_v52 = vshrl.u32 %v815_v26, %v987_v50  ;;  %v520_v57 = vshll.u32 %v815_v26, %v511_v29 }
  0x41   :  { %v521_v13 = vshrl.u32 %v816_v28, %v987_v50  ;;  %v440_v60 = vadd.s32 %v439_v48, %v435_v44  ;;  %v514_v61 = vshll.u32 %v813_v22, %v511_v29  ;;  %v515_v63 = vshrl.u32 %v814_v24, %v987_v50 }
  0x42   :  { %v734_v31 = vadd.s32 4294967294, %v139_v23  ;;  %v524_v8 = vshrl.u32 %v817_v30, %v987_v50  ;;  %v526_v9 = vshll.u32 %v817_v30, %v511_v29  ;;  %vm35_vm7 = vcmp.lt.s32.totalorder %v843_v2, 0 }
  0x43   :  { %v441_v26 = vadd.s32 536870912, %v440_v60  ;;  %v1009_v10 = vor.u32 %v518_v52, %v517_v51  ;;  %v527_v11 = vshrl.u32 %v818_v38, %v987_v50  ;;  %v1013_v46 = vor.u32 %v521_v13, %v520_v57 }
  0x44   :  { %vm735_vm5 = vcmp.lt.s32.totalorder %v734_v31, 0  ;;  %vm532_vm8 = vcmp.lt.s32.totalorder %v993_v49, 4  ;;  %v1018_v14 = vor.u32 %v515_v63, %v514_v61  ;;  %vm529_vm9 = vcmp.lt.s32.totalorder %v993_v49, 1 }
  0x45   :  { %v142_v36 = vsel %vm735_vm5, 0, %v734_v31  ;;  %v528_v15 = vor.u32 %v527_v11, %v526_v9  ;;  %v158_v16 = vsel %vm35_vm7, %v157_v58, %v958_v45  ;;  %v1024_v17 = vshll.u32 %v505_v47, 8 }
  0x46   :  { %v143_v41 = vsub.s32 32, %v142_v36  ;;  %v144_v42 = vshll.u32 %v135_v4, %v142_v36  ;;  %v147_v19 = vsub.s32 4294967266, %v142_v36  ;;  %v523_v4 = vshll.u32 %v816_v28, %v511_v29 }
  0x47   :  { %v1016_v28 = vshrl.u32 %v441_v26, 30  ;;  %vm531_vm10 = vcmp.lt.s32.totalorder %v993_v49, 3  ;;  %vm34_vm11 = vcmp.le.f32.partialorder %v33_v3, 0.7853982  ;;  %vm530_vm12 = vcmp.lt.s32.totalorder %v993_v49, 2 }
  0x48   :  { %v145_v62 = vshrl.u32 %v127_v7, %v143_v41  ;;  %v148_v6 = vadd.s32 127, %v147_v19  ;;  %v525_v24 = vor.u32 %v524_v8, %v523_v4  ;;  %v541_v45 = vsel %vm529_vm9, %v1009_v10, %v1013_v46 }
  0x49   :  { %v443_v38 = vshll.u32 %v1016_v28, 30  ;;  %v1037_v21 = vsel %vm34_vm11, 0, %v158_v16  ;;  %v537_v20 = vsel %vm529_vm9, %v1018_v14, %v1009_v10  ;;  %v542_v27 = vsel %vm532_vm8, %v528_v15, 1326507024 }
  0x4a   :  { %v146_v55 = vor.u32 %v145_v62, %v144_v42  ;;  %v149_v56 = vshll.u32 %v148_v6, 23  ;;  %v538_v59 = vsel %vm532_vm8, %v525_v24, 920167782  ;;  %v543_v29 = vsel %vm531_vm10, %v525_v24, %v542_v27 }
  0x4b   :  { %v444_v23 = vsub.s32 %v440_v60, %v443_v38  ;;  %v539_v53 = vsel %vm531_vm10, %v1013_v46, %v538_v59  ;;  %v546_v31 = vand.u32 65535, %v1024_v17  ;;  %v544_v35 = vsel %vm530_vm12, %v541_v45, %v543_v29 }
  0x4c   :  { %v150_v5 = vor.u32 4788187, %v149_v56  ;;  %v153_v32 = vcvt.s32.f32 %v146_v55  ;;  %v547_v36 = vshrl.u32 %v1024_v17, 16  ;;  %v548_v37 = vand.u32 65535, %v544_v35 }
  0x4d   :  { %vm445_vm13 = vcmp.lt.s32.totalorder %v444_v23, 0  ;;  %v446_v7 = vsub.s32 0, %v444_v23  ;;  %v549_v41 = vshrl.u32 %v544_v35, 16  ;;  %v331_v42 = vadd.s32 3, %v1037_v21 }
  0x4e   :  { %v151_v12 = vand.u32 2147483647, %v150_v5  ;;  %v540_v58 = vsel %vm530_vm12, %v537_v20, %v539_v53  ;;  %v550_v47 = vmul.u32 %v548_v37, %v546_v31  ;;  %v1062_v51 = vmul.u32 %v548_v37, %v547_v36 }
  0x4f   :  { %v447_v19 = vsel %vm445_vm13, %v446_v7, %v444_v23  ;;  %v1060_v48 = vmul.u32 %v549_v41, %v546_v31  ;;  %v332_v57 = vand.u32 3, %v331_v42  ;;  %v436_v13 = vadd.s32 %v979_v34, %v977_v33 }
  0x50   :  { %v154_v30 = vmul.f32 %v153_v32, %v151_v12  ;;  %v448_v6 = vclz %v447_v19  ;;  %v571_v61 = vshrl.u32 %v540_v58, 16  ;;  %v570_v5 = vand.u32 65535, %v540_v58 }
  0x51   :  { %v554_v60 = vshll.u32 %v1060_v48, 16  ;;  %v553_v8 = vmul.u32 %v549_v41, %v547_v36  ;;  %v556_v9 = vshll.u32 %v1062_v51, 16  ;;  %vm176_vm0 = vweird.f32 %v843_v2 }
  0x52   :  { %v155_v18 = vxor.u32 2147483648, %v154_v30  ;;  %v740_v56 = vadd.s32 4294967294, %v448_v6  ;;  %v573_v34 = vmul.u32 %v571_v61, %v546_v31  ;;  %vm337_vm1 = vcmp.eq.s32.totalorder %v332_v57, 2 }
  0x53   :  { %vm558_vm15 = vc.u32 %v550_v47, %v554_v60  ;;  %v560_v33 = vadd.s32 %v554_v60, %v550_v47  ;;  %v574_v27 = vmul.u32 %v570_v5, %v547_v36  ;;  %v572_v35 = vmul.u32 %v570_v5, %v546_v31 }
  0x54   :  { %v156_v3 = vsel %vm35_vm7, %v155_v18, %v154_v30  ;;  %vm741_vm14 = vcmp.lt.s32.totalorder %v740_v56, 0  ;;  %v559_v30 = vsel %vm558_vm15, 1, %v819_v40  ;;  %v513_v18 = vshrl.u32 %v813_v22, %v987_v50 }
  0x55   :  { %v159_v54 = vsel %vm34_vm11, %v843_v2, %v156_v3  ;;  %v451_v32 = vsel %vm741_vm14, 0, %v740_v56  ;;  %v561_v20 = vadd.s32 %v559_v30, %v553_v8  ;;  %vm562_vm2 = vc.u32 %v560_v33, %v556_v9 }
  0x56   :  { %v161_v39 = vmul.f32 %v159_v54, %v159_v54  ;;  %v452_v12 = vsub.s32 32, %v451_v32  ;;  %v453_v24 = vshll.u32 %v444_v23, %v451_v32  ;;  %v456_v15 = vsub.s32 4294967266, %v451_v32 }
  0x57   :  { %v563_v7 = vsel %vm562_vm2, 1, %v819_v40  ;;  %vm334_vm3 = vcmp.eq.s32.totalorder %v332_v57, 0  ;;  %v555_v22 = vshrl.u32 %v1060_v48, 16  ;;  %vm333_vm4 = vcmp.lt.s32.totalorder %v332_v57, 2 }
  0x58   :  { %v162_v44 = vmul.f32 -0.001358992, %v161_v39  ;;  %v169_v62 = vmul.f32 -0.00019511016, %v161_v39  ;;  %v454_v59 = vshrl.u32 %v436_v13, %v452_v12  ;;  %v457_v45 = vadd.s32 127, %v456_v15 }
  0x59   :  { %v565_v19 = vadd.s32 %v563_v7, %v561_v20  ;;  %v578_v6 = vshll.u32 %v574_v27, 16  ;;  %vm1086_vm5 = vcmp.le.f32.partialorder %v342_v43, 0.7853982  ;;  %v534_v48 = vsel %vm532_vm8, %v1013_v46, 2102212464 }
  0x5a   :  { %v163_v52 = vadd.f32 0.041655596, %v162_v44  ;;  %v170_v55 = vadd.f32 0.008332121, %v169_v62  ;;  %v455_v53 = vor.u32 %v454_v59, %v453_v24  ;;  %v458_v29 = vshll.u32 %v457_v45, 23 }
  0x5b   :  { %v575_v44 = vmul.u32 %v571_v61, %v547_v36  ;;  %v566_v57 = vadd.s32 %v565_v19, %v555_v22  ;;  %vm344_vm7 = vcmp.lt.s32.totalorder %v837_v0, 0  ;;  %v533_v60 = vsel %vm529_vm9, %v513_v18, %v1018_v14 }
  0x5c   :  { %v164_v63 = vmul.f32 %v163_v52, %v161_v39  ;;  %v171_v4 = vmul.f32 %v170_v55, %v161_v39  ;;  %v459_v50 = vor.u32 4788187, %v458_v29  ;;  %v462_v42 = vcvt.s32.f32 %v455_v53 }
  0x5d   :  { %v557_v52 = vshrl.u32 %v1062_v51, 16  ;;  %v577_v61 = vshrl.u32 %v573_v34, 16  ;;  %v535_v51 = vsel %vm531_vm10, %v1009_v10, %v534_v48  ;;  %v466_v5 = vsub.s32 4, %v1016_v28  ;;  %v31_v48 = vld [vmem:[#allocation2 + $0x3] sm:$0x1] }
  0x5e   :  { %v165_v26 = vadd.f32 -0.4999988, %v164_v63  ;;  %v172_v11 = vadd.f32 -0.16666654, %v171_v4  ;;  %v460_v58 = vand.u32 2147483647, %v459_v50  ;;  %v536_v10 = vsel %vm530_vm12, %v533_v60, %v535_v51 }
  0x5f   :  { %v579_v32 = vshrl.u32 %v574_v27, 16  ;;  %v1113_v9 = vadd.s32 %v566_v57, %v557_v52  ;;  %v467_v15 = vsel %vm344_vm7, %v466_v5, %v1016_v28  ;;  %v177_v18 = vand.u32 3, %v1037_v21 }
  0x60   :  { %v166_v16 = vmul.f32 %v165_v26, %v161_v39  ;;  %v173_v38 = vmul.f32 %v172_v11, %v161_v39  ;;  %v576_v39 = vshll.u32 %v573_v34, 16  ;;  %v463_v43 = vmul.f32 %v462_v42, %v460_v58 }
  0x61   :  { %v469_v45 = vsel %vm1086_vm5, 0, %v467_v15  ;;  %vm182_vm9 = vcmp.eq.s32.totalorder %v177_v18, 2  ;;  %vm179_vm10 = vcmp.eq.s32.totalorder %v177_v18, 0  ;;  %vm178_vm12 = vcmp.lt.s32.totalorder %v177_v18, 2 }
  0x62   :  { %v1072_v3 = vadd.f32 1.0, %v166_v16  ;;  %v174_v23 = vadd.f32 1.0, %v173_v38  ;;  %vm580_vm6 = vc.u32 %v572_v35, %v576_v39  ;;  %v582_v47 = vadd.s32 %v576_v39, %v572_v35 }
  0x63   :  { %v581_v55 = vsel %vm580_vm6, 1, %v819_v40  ;;  %v464_v46 = vxor.u32 2147483648, %v463_v43  ;;  %v590_v38 = vmul.u32 %v1024_v17, %v536_v10  ;;  %v486_v35 = vadd.s32 3, %v469_v45 }
  0x64   :  { %v1075_v37 = vmul.f32 %v174_v23, %v159_v54  ;;  %v183_v41 = vxor.u32 2147483648, %v1072_v3  ;;  %v583_v13 = vadd.s32 %v581_v55, %v575_v44  ;;  %vm584_vm11 = vc.u32 %v582_v47, %v578_v6 }
  0x65   :  { %v585_v4 = vsel %vm584_vm11, 1, %v819_v40  ;;  %v465_v14 = vsel %vm344_vm7, %v464_v46, %v463_v43  ;;  %v1115_v26 = vadd.s32 %v582_v47, %v578_v6  ;;  %v487_v44 = vand.u32 3, %v486_v35 }
  0x66   :  { %v180_v62 = vxor.u32 2147483648, %v1075_v37  ;;  %v339_v31 = vsel %vm337_vm1, %v183_v41, %v1075_v37  ;;  %v587_v8 = vadd.s32 %v585_v4, %v583_v13  ;;  %v468_v11 = vsel %vm1086_vm5, %v837_v0, %v465_v14 }
  0x67   :  { %v470_v24 = vmul.f32 %v468_v11, %v468_v11  ;;  %vm592_vm8 = vc.u32 %v1113_v9, %v1115_v26  ;;  %v184_v19 = vsel %vm182_vm9, %v183_v41, %v1075_v37  ;;  %vm489_vm13 = vcmp.eq.s32.totalorder %v487_v44, 0 }
  0x68   :  { %v336_v36 = vsel %vm334_vm3, %v1072_v3, %v180_v62  ;;  %v588_v12 = vadd.s32 %v587_v8, %v577_v61  ;;  %vm492_vm14 = vcmp.eq.s32.totalorder %v487_v44, 2  ;;  %vm488_vm1 = vcmp.lt.s32.totalorder %v487_v44, 2 }
  0x69   :  { %v340_v56 = vsel %vm333_vm4, %v336_v36, %v339_v31  ;;  %v471_v34 = vmul.f32 -0.001358992, %v470_v24  ;;  %v478_v16 = vmul.f32 -0.00019511016, %v470_v24  ;;  %v181_v31 = vsel %vm179_vm10, %v1072_v3, %v180_v62  ;;  %v29_v36 = vld [vmem:[#allocation2 + $0x2] sm:$0x1] }
  0x6a   :  { %v1104_v63 = vsel %vm176_vm0, nan, %v340_v56  ;;  %v589_v30 = vadd.s32 %v588_v12, %v579_v32  ;;  %v185_v56 = vsel %vm178_vm12, %v181_v31, %v184_v19  ;;  %v652_v13 = vmul.f32 0.1, %v29_v36 }
  0x6b   :  { %v661_v40 = vmul.f32 0.1, %v1104_v63  ;;  %v472_v20 = vadd.f32 0.041655596, %v471_v34  ;;  %v479_v27 = vadd.f32 0.008332121, %v478_v16  ;;  %v591_v34 = vadd.s32 %v1115_v26, %v1113_v9 }
  0x6c   :  { %v593_v49 = vadd.s32 1, %v589_v30  ;;  %v654_v3 = vmul.f32 0.3, %v31_v48  ;;  %v657_v62 = vmul.f32 0.2, %v29_v36  ;;  %v186_v60 = vsel %vm176_vm0, nan, %v185_v56 }
  0x6d   :  { %v662_v33 = vmul.f32 %v661_v40, %v1104_v63  ;;  %v473_v53 = vmul.f32 %v472_v20, %v470_v24  ;;  %v480_v29 = vmul.f32 %v479_v27, %v470_v24  ;;  %v653_v5 = vmul.f32 %v652_v13, %v29_v36 }
  0x6e   :  { %v594_v28 = vsel %vm592_vm8, %v593_v49, %v589_v30  ;;  %v655_v32 = vmul.f32 %v654_v3, %v31_v48  ;;  %v658_v14 = vmul.f32 %v657_v62, %v31_v48  ;;  %vm485_vm0 = vweird.f32 %v837_v0 }
  0x6f   :  { %v663_v59 = vadd.f32 0.2, %v662_v33  ;;  %v595_v7 = vadd.s32 %v594_v28, %v590_v38  ;;  %v474_v17 = vadd.f32 -0.4999988, %v473_v53  ;;  %v481_v39 = vadd.f32 -0.16666654, %v480_v29 }
  0x70   :  { %v656_v12 = vadd.f32 %v655_v32, %v653_v5  ;;  %v659_v2 = vmul.f32 %v658_v14, %v186_v60  ;;  %v682_v16 = vmul.f32 0.04, %v1104_v63  ;;  %v680_v28 = vmul.f32 %v658_v14, %v1104_v63 }
  0x71   :  { %v1133_v23 = vmul.f32 0.2, %v663_v59  ;;  %v596_v22 = vadd.s32 536870912, %v595_v7  ;;  %v475_v21 = vmul.f32 %v474_v17, %v470_v24  ;;  %v482_v50 = vmul.f32 %v481_v39, %v470_v24 }
  0x72   :  { %v660_v49 = vsub.f32 %v656_v12, %v659_v2  ;;  %v693_v35 = vmul.f32 0.2, %v31_v48  ;;  %v697_v17 = vmul.f32 0.6, %v31_v48  ;;  %v698_v44 = vmul.f32 %v657_v62, %v186_v60 }
  0x73   :  { %756 = vrcp.f32 %v1133_v23  ;;  %v1136_v42 = vshrl.u32 %v596_v22, 30  ;;  %v476_v6 = vadd.f32 1.0, %v475_v21  ;;  %v483_v54 = vadd.f32 1.0, %v482_v50 }
  0x74   :  { %vm670_vm2 = vweird.f32 %v1133_v23  ;;  %v674_v40 = vand.u32 2147483647, %v1133_v23  ;;  %v676_v30 = vand.u32 2147483648, %v1133_v23  ;;  %v694_v19 = vmul.f32 %v693_v35, %v186_v60 }
  0x75   :  { %v598_v58 = vshll.u32 %v1136_v42, 30  ;;  %v484_v52 = vmul.f32 %v483_v54, %v468_v11  ;;  %v493_v43 = vxor.u32 2147483648, %v476_v6  ;;  %vm499_vm7 = vcmp.lt.s32.totalorder %v839_v1, 0 }
  0x76   :  { %vm675_vm6 = vcmp.eq.f32.partialorder %v674_v40, 8.507059e+37  ;;  %v677_v27 = vor.u32 1.1754944e-38, %v676_v30  ;;  %v621_v48 = vsub.s32 4, %v1136_v42  ;;  %vm498_vm11 = vcmp.le.f32.partialorder %v497_v25, 0.7853982 }
  0x77   :  { %v599_v55 = vsub.s32 %v595_v7, %v598_v58  ;;  %v490_v41 = vxor.u32 2147483648, %v484_v52  ;;  %v494_v51 = vsel %vm492_vm14, %v493_v43, %v484_v52  ;;  %v683_v7 = vmul.f32 %v682_v16, %v186_v60 }
  0x78   :  { %v695_v58 = vsub.f32 %v657_v62, %v694_v19  ;;  %v622_v62 = vsel %vm499_vm7, %v621_v48, %v1136_v42  ;;  %vm640_vm12 = vweird.f32 %v839_v1 }
  0x79   :  { %v757_v47 = vpop.eup %756  ;;  %vm600_vm15 = vcmp.lt.s32.totalorder %v599_v55, 0  ;;  %v601_v37 = vsub.s32 0, %v599_v55  ;;  %v491_v8 = vsel %vm489_vm13, %v476_v6, %v490_v41  ;;  %v684_v50 = vmul.f32 %v683_v7, %v660_v49 }
  0x7a   :  { %v666_v57 = vmul.f32 %v757_v47, %v1133_v23  ;;  %vm671_vm3 = vweird.f32 %v757_v47  ;;  %v495_v33 = vsel %vm488_vm1, %v491_v8, %v494_v51 }
  0x7b   :  { %v602_v61 = vsel %vm600_vm15, %v601_v37, %v599_v55  ;;  %vm1152_vm4 = vmor %vm670_vm2, %vm671_vm3  ;;  %v496_v9 = vsel %vm485_vm0, nan, %v495_v33 }
  0x7c   :  { %v667_v46 = vsub.f32 1.0, %v666_v57  ;;  %v603_v4 = vclz %v602_v61  ;;  %v688_v63 = vmul.f32 2.94, %v496_v9 }
  0x7e   :  { %v668_v11 = vmul.f32 %v757_v47, %v667_v46  ;;  %v743_v10 = vadd.s32 4294967294, %v603_v4  ;;  %v624_v46 = vsel %vm498_vm11, 0, %v622_v62 }
  0x7f   :  { %v641_v8 = vadd.s32 3, %v624_v46 }
  0x80   :  { %v669_v24 = vadd.f32 %v757_v47, %v668_v11  ;;  %vm744_vm5 = vcmp.lt.s32.totalorder %v743_v10, 0 }
  0x81   :  { %v606_v38 = vsel %vm744_vm5, 0, %v743_v10  ;;  %v642_v12 = vand.u32 3, %v641_v8 }
  0x82   :  { %v673_v59 = vsel %vm1152_vm4, %v757_v47, %v669_v24  ;;  %v607_v18 = vsub.s32 32, %v606_v38  ;;  %v608_v45 = vshll.u32 %v599_v55, %v606_v38  ;;  %v611_v20 = vsub.s32 4294967266, %v606_v38 }
  0x83   :  { %v678_v29 = vsel %vm675_vm6, %v677_v27, %v673_v59  ;;  %v699_v47 = vsub.f32 %v697_v17, %v698_v44  ;;  %vm647_vm8 = vcmp.eq.s32.totalorder %v642_v12, 2  ;;  %vm644_vm9 = vcmp.eq.s32.totalorder %v642_v12, 0 }
  0x84   :  { %v609_v23 = vshrl.u32 %v591_v34, %v607_v18  ;;  %v612_v53 = vadd.s32 127, %v611_v20  ;;  %v685_v26 = vmul.f32 %v678_v29, %v678_v29  ;;  %v681_v21 = vmul.f32 %v680_v28, %v678_v29 }
  0x85   :  { %v696_v55 = vmul.f32 %v695_v58, %v678_v29  ;;  %v700_v43 = vmul.f32 %v699_v47, %v678_v29  ;;  %vm643_vm10 = vcmp.lt.s32.totalorder %v642_v12, 2 }
  0x86   :  { %v610_v39 = vor.u32 %v609_v23, %v608_v45  ;;  %v613_v22 = vshll.u32 %v612_v53, 23  ;;  %v686_v54 = vmul.f32 %v685_v26, %v684_v50 }
  0x87   :  { %v702_v57 = vmul.f32 0.1, %v696_v55  ;;  %707 = vst [vmem:[#allocation5] sm:$0x1] %v696_v55  ;;  %v705_v20 = vmul.f32 0.1, %v700_v43 }
  0x88   :  { %v614_v31 = vor.u32 4788187, %v613_v22  ;;  %v617_v6 = vcvt.s32.f32 %v610_v39  ;;  %v687_v52 = vsub.f32 %v681_v21, %v686_v54  ;;  %709 = vst [vmem:[#allocation5 + $0x1] sm:$0x1] %v700_v43 }
  0x8a   :  { %v615_v36 = vand.u32 2147483647, %v614_v31  ;;  %v689_v56 = vadd.f32 %v688_v63, %v687_v52  ;;  %v690_v49 = vsub.f32 0.0, %v687_v52 }
  0x8c   :  { %v618_v0 = vmul.f32 %v617_v6, %v615_v36  ;;  %v701_v37 = vsub.f32 0.0, %v689_v56 }
  0x8e   :  { %v619_v41 = vxor.u32 2147483648, %v618_v0  ;;  %v703_v3 = vsub.f32 %v701_v37, %v702_v57 }
  0x90   :  { %v620_v13 = vsel %vm499_vm7, %v619_v41, %v618_v0  ;;  %711 = vst [vmem:[#allocation5 + $0x2] sm:$0x1] %v703_v3 }
  0x91   :  { %v623_v60 = vsel %vm498_vm11, %v839_v1, %v620_v13 }
  0x92   :  { %v625_v61 = vmul.f32 %v623_v60, %v623_v60 }
  0x94   :  { %v626_v51 = vmul.f32 -0.001358992, %v625_v61  ;;  %v633_v4 = vmul.f32 -0.00019511016, %v625_v61 }
  0x96   :  { %v627_v5 = vadd.f32 0.041655596, %v626_v51  ;;  %v634_v32 = vadd.f32 0.008332121, %v633_v4 }
  0x98   :  { %v628_v14 = vmul.f32 %v627_v5, %v625_v61  ;;  %v635_v11 = vmul.f32 %v634_v32, %v625_v61 }
  0x9a   :  { %v629_v25 = vadd.f32 -0.4999988, %v628_v14  ;;  %v636_v10 = vadd.f32 -0.16666654, %v635_v11 }
  0x9c   :  { %v630_v40 = vmul.f32 %v629_v25, %v625_v61  ;;  %v637_v2 = vmul.f32 %v636_v10, %v625_v61 }
  0x9e   :  { %v631_v24 = vadd.f32 1.0, %v630_v40  ;;  %v638_v15 = vadd.f32 1.0, %v637_v2 }
  0xa0   :  { %v639_v42 = vmul.f32 %v638_v15, %v623_v60  ;;  %v648_v30 = vxor.u32 2147483648, %v631_v24 }
  0xa2   :  { %v645_v33 = vxor.u32 2147483648, %v639_v42  ;;  %v649_v34 = vsel %vm647_vm8, %v648_v30, %v639_v42 }
  0xa4   :  { %v646_v16 = vsel %vm644_vm9, %v631_v24, %v645_v33 }
  0xa5   :  { %v650_v38 = vsel %vm643_vm10, %v646_v16, %v649_v34 }
  0xa6   :  { %v651_v59 = vsel %vm640_vm12, nan, %v650_v38 }
  0xa7   :  { %v691_v18 = vmul.f32 0.98, %v651_v59 }
  0xa9   :  { %v692_v45 = vadd.f32 %v691_v18, %v690_v49 }
  0xab   :  { %v704_v27 = vsub.f32 0.0, %v692_v45 }
  0xad   :  { %v706_v28 = vsub.f32 %v704_v27, %v705_v20 }
  0xaf   :  { %713 = vst [vmem:[#allocation5 + $0x3] sm:$0x1] %v706_v28 }
  0xb0   :  { %726 = dma.vmem_to_hbm [thread:$0]  %s719_s13, 64, %s721_s16, [#allocation4], %s811_s11, %s811_s11, %s812_s12  }
  0xb1   :  { %808 = dma.done.wait [#allocation4], 64  }
  0xb2   :  { %809 = vsyncadd [#allocation4], 4294967232 }
  0xb3   :  { %731 = vsyncpa [#allocation3], 1 }
  0xb4   :  { %732 = vsyncpa [#allocation4], 1 }

</bundles_post_ra>
